<compile_context>
chip_gen: v5e
topology: v5e:2x2
jax: 0.10.0
libtpu: 0.0.40
codegen_flags: <defaults>
</compile_context>

<pallas_src>
import functools

import jax
import jax.numpy as jnp
from jax.experimental import pallas as pl
from jax.experimental.pallas import tpu as pltpu


# ----------------------------------------------------------------------------
# Tile selection helpers
# ----------------------------------------------------------------------------
def _pick_batch_tile(B):
    # Split the batch in two so the "parallel" grid axis can shard across the
    # two TensorCores of a v7x chip; a 2-step grid costs ~0.7us extra on
    # single-TC v5e/v6e, which is noise.
    half = B // 2
    if B % 2 == 0 and half % 8 == 0:
        return half
    return B


def _pick_seq_tile(S, tb, D, itemsize=2, budget=8 << 20):
    # Whole sequence per grid step when the double-buffered bf16 h tile fits a
    # conservative 8 MiB budget (well under the scoped-VMEM default on every
    # generation, incl. v7x's 64 MiB physical VMEM); otherwise the largest
    # multiple-of-8 divisor of S that does.
    if 2 * tb * S * D * itemsize <= budget:
        return S
    cap = max(8, budget // (2 * tb * D * itemsize))
    ts = (cap // 8) * 8
    while ts > 8 and S % ts != 0:
        ts -= 8
    return ts if S % ts == 0 else S


# ----------------------------------------------------------------------------
# Kernel 1: ImagePrefix  (spatial mean + folded enc/proj linear, no weight
#                         inflation: contraction depth stays K = C_img)
# ----------------------------------------------------------------------------
def _image_prefix_kernel(x_ref, w_ref, b_ref, out_ref, *, inv_hw, cimg):
    # x_ref: (tb, C_img, HW) f32 (images streamed once, no host-side cast)
    # w_ref: (C_img, DP) f32 folded weight; b_ref: (1, DP) f32 folded bias
    pooled = jnp.sum(x_ref[...], axis=-1, keepdims=True) * inv_hw   # (tb,C,1)
    w = w_ref[...]
    out = jnp.zeros(out_ref.shape, jnp.float32) + b_ref[...]        # (tb, DP)
    # K = C_img is tiny -> unrolled VPU FMAs instead of a padded MXU matmul.
    for c in range(cimg):
        out = out + pooled[:, c, :] * w[c:c + 1, :]                 # (tb,1)*(1,DP)
    out_ref[...] = out.astype(out_ref.dtype)                        # bf16 finalize


def image_prefix_forward(images, W_enc, b_enc, W_proj, b_proj):
    B, Cimg, H, W = images.shape
    HW = H * W
    DP = W_proj.shape[1]

    # No nonlinearity between pool, enc and proj -> fold them exactly:
    #   out = mean_hw(x) @ (W_enc @ W_proj) + (b_enc @ W_proj + b_proj)
    # The folded weight stays (C_img, DP); the 1/HW mean is applied in-kernel.
    W_fused = jnp.dot(W_enc, W_proj).astype(jnp.float32)                    # (C, DP)
    b_fused = (jnp.dot(b_enc, W_proj) + b_proj).astype(jnp.float32).reshape(1, DP)

    x = images.reshape(B, Cimg, HW)          # free reshape, stays f32 in HBM
    tb = _pick_batch_tile(B)

    kernel = functools.partial(_image_prefix_kernel, inv_hw=1.0 / HW, cimg=Cimg)

    return pl.pallas_call(
        kernel,
        out_shape=jax.ShapeDtypeStruct((B, DP), jnp.bfloat16),
        grid=(B // tb,),
        in_specs=[
            pl.BlockSpec((tb, Cimg, HW), lambda bi: (bi, 0, 0)),
            pl.BlockSpec((Cimg, DP), lambda bi: (0, 0)),
            pl.BlockSpec((1, DP), lambda bi: (0, 0)),
        ],
        out_specs=pl.BlockSpec((tb, DP), lambda bi: (bi, 0)),
        compiler_params=pltpu.CompilerParams(
            dimension_semantics=("parallel",)),
    )(x, W_fused, b_fused)


# ----------------------------------------------------------------------------
# Kernel 2: weighted pooling (VPU) + ClassificationHead + softmax + per-ex NLL
# ----------------------------------------------------------------------------
def _classifier_kernel(h_ref, w_ref, wc_ref, bc_ref, oh_ref, out_ref, acc_ref,
                       *, num_classes):
    si = pl.program_id(1)
    tb = acc_ref.shape[0]

    @pl.when(si == 0)
    def _():
        acc_ref[...] = jnp.zeros_like(acc_ref)

    # einsum('bsd,bs->bd') weighted pooling on the VPU (no M=1 MXU pushes):
    # per batch row, (ts, D) bf16 * (ts, 1) f32 mask -> f32, sublane-reduce.
    rows = []
    for b in range(tb):                                 # static unroll, tb small
        hb = h_ref[b]                                   # (ts, D) bf16
        wb = w_ref[b]                                   # (ts, 1) f32 (mask stays f32)
        rows.append(jnp.sum(hb * wb, axis=0, keepdims=True))       # (1, D) f32
    acc_ref[...] += jnp.concatenate(rows, axis=0)                   # dense (tb, D)

    @pl.when(si == pl.num_programs(1) - 1)
    def _():
        class_emb = acc_ref[...]                                    # (tb, D) f32
        logits = jnp.dot(class_emb, wc_ref[...],
                         preferred_element_type=jnp.float32) + bc_ref[...]
        cpad = out_ref.shape[1]
        col = jax.lax.broadcasted_iota(jnp.int32, (tb, cpad), 1)
        valid = col < num_classes
        logits = jnp.where(valid, logits, -1e30)        # mask lane padding

        # max-stabilized softmax, f32 stats, EUP reciprocal (free slot)
        m = jnp.max(logits, axis=-1, keepdims=True)
        e = jnp.where(valid, jnp.exp(logits - m), 0.0)
        denom = jnp.sum(e, axis=-1, keepdims=True)
        probs = e * pl.reciprocal(denom, approx=True)

        # cross-entropy per example via lane-dense one-hot labels
        lse = m + jnp.log(denom)
        label_logit = jnp.sum(logits * oh_ref[...], axis=-1, keepdims=True)
        nll = lse - label_logit                                     # (tb, 1)

        # One lane-dense store: probs in cols [0, C), per-example NLL in col C.
        out_ref[...] = jnp.where(col == num_classes, nll, probs)


def classifier_forward(hidden_states, w_mask, W_cls, b_cls, labels):
    B, S, D = hidden_states.shape
    C = W_cls.shape[1]
    # Lane-dense class dim with at least one spare column for the NLL.
    C_PAD = ((C + 1 + 127) // 128) * 128

    W_cls_pad = jnp.zeros((D, C_PAD), jnp.float32).at[:, :C].set(
        W_cls.astype(jnp.float32))
    b_cls_pad = jnp.zeros((1, C_PAD), jnp.float32).at[:, :C].set(
        b_cls.reshape(1, C).astype(jnp.float32))

    # Clamp labels (F.cross_entropy would raise on out-of-range labels).
    labels = jnp.clip(labels.astype(jnp.int32), 0, C - 1)
    onehot = jax.nn.one_hot(labels, C_PAD, dtype=jnp.float32)       # (B, C_PAD)

    h = hidden_states                       # already bf16 end-to-end, no cast
    # Mask kept f32 and shaped (B, S, 1) so its S axis lines up with h's
    # sublane axis inside the kernel (no in-kernel relayout of the mask).
    w3 = w_mask.astype(jnp.float32).reshape(B, S, 1)

    tb = _pick_batch_tile(B)
    ts = _pick_seq_tile(S, tb, D)

    kernel = functools.partial(_classifier_kernel, num_classes=C)

    out = pl.pallas_call(
        kernel,
        out_shape=jax.ShapeDtypeStruct((B, C_PAD), jnp.float32),
        grid=(B // tb, S // ts),
        in_specs=[
            pl.BlockSpec((tb, ts, D), lambda bi, si: (bi, si, 0)),
            pl.BlockSpec((tb, ts, 1), lambda bi, si: (bi, si, 0)),
            pl.BlockSpec((D, C_PAD), lambda bi, si: (0, 0)),
            pl.BlockSpec((1, C_PAD), lambda bi, si: (0, 0)),
            pl.BlockSpec((tb, C_PAD), lambda bi, si: (bi, 0)),
        ],
        out_specs=pl.BlockSpec((tb, C_PAD), lambda bi, si: (bi, 0)),
        scratch_shapes=[pltpu.VMEM((tb, D), jnp.float32)],
        compiler_params=pltpu.CompilerParams(
            dimension_semantics=("parallel", "arbitrary")),
    )(h, w3, W_cls_pad, b_cls_pad, onehot)

    probs = out[:, :C]
    loss = jnp.mean(out[:, C])              # batch-mean of the per-example NLL
    return loss, probs


# ----------------------------------------------------------------------------
# Full MultimodalClassifier.forward (glue in plain JAX, hot paths in Pallas)
# ----------------------------------------------------------------------------
def multimodal_classifier_forward(images, captions, labels, params,
                                  prefix_len, eos_token, num_classes):
    del num_classes  # taken from W_cls inside classifier_forward
    B, S = captions.shape
    D = params["word_emb"].shape[1]

    # --- ImagePrefix: (B,C,H,W) -> (B, P, D) bf16 (Pallas kernel) ----------
    img_flat = image_prefix_forward(
        images, params["W_enc"], params["b_enc"],
        params["W_proj"], params["b_proj"])                       # (B, P*D) bf16
    img_emb = img_flat.reshape(B, prefix_len, D)
    # dropout (p=0 / eval) and use_layernorm=False -> identity

    # --- word embeddings for captions[:, :-prefix_len] (glue gather) -------
    text_tokens = captions[:, :-prefix_len]
    word_emb_bf16 = params["word_emb"].astype(jnp.bfloat16)        # bf16 table
    text_emb = jnp.take(word_emb_bf16, text_tokens, axis=0)        # (B, S-P, D)
    embeddings = jnp.concatenate([img_emb, text_emb], axis=1)      # (B, S, D) bf16

    # TODO(synk): pretrained LM stack stubbed -> last hidden state = embeddings
    hidden_states = embeddings

    # --- build_weight_mask (interface_type='last_hidden_state'), kept f32 --
    w = (captions != eos_token).astype(jnp.float32)                # (B, S)
    w_shift = jnp.concatenate([w[:, 1:], jnp.zeros((B, 1), jnp.float32)], axis=1)
    w = w - w_shift                                  # +1 at last non-eos token
    w = jnp.concatenate([jnp.zeros((B, prefix_len), jnp.float32),
                         w[:, :-prefix_len]], axis=1)              # (B, S)

    # --- weighted pool + class head + softmax + CE (Pallas kernel) ----------
    loss, probs = classifier_forward(hidden_states, w,
                                     params["W_cls"], params["b_cls"], labels)
    return loss, probs


# ----------------------------------------------------------------------------
if __name__ == "__main__":
    key = jax.random.PRNGKey(0)
    B, Cimg, H, W = 16, 4, 16, 16     # images (NCHW)
    D = 128                           # lm hidden size
    P = 4                             # image_prefix_seq_len (config.image_seq_len)
    S = 256                           # lm max_position_embeddings == caption length
    E = 256                           # (stub) encoder_out_dim
    V = 512                           # vocab size
    C = 10                            # num_classes
    EOS = 0                           # eos token id

    ks = jax.random.split(key, 11)
    params = {
        "W_enc":    jax.random.normal(ks[0], (Cimg, E), jnp.float32) * 0.10,
        "b_enc":    jax.random.normal(ks[1], (1, E), jnp.float32) * 0.10,
        "W_proj":   jax.random.normal(ks[2], (E, D * P), jnp.float32) * 0.05,
        "b_proj":   jax.random.normal(ks[3], (1, D * P), jnp.float32) * 0.05,
        "word_emb": jax.random.normal(ks[4], (V, D), jnp.float32) * 0.05,
        "W_cls":    jax.random.normal(ks[5], (D, C), jnp.float32) * 0.10,
        "b_cls":    jax.random.normal(ks[6], (1, C), jnp.float32) * 0.10,
    }

    images = jax.random.normal(ks[7], (B, Cimg, H, W), jnp.float32)
    # captions: per-row prefix of non-eos tokens followed by eos padding
    # (build_weight_mask's "exactly one nonzero per row" structure; last
    # non-eos token never falls inside the final prefix_len positions).
    lens = jax.random.randint(ks[8], (B,), 2, S - P - 8)
    toks = jax.random.randint(ks[9], (B, S), 1, V)
    pos = jnp.arange(S)[None, :]
    captions = jnp.where(pos < lens[:, None], toks, EOS).astype(jnp.int32)
    labels = jax.random.randint(ks[10], (B,), 0, C).astype(jnp.int32)

    loss, probs = multimodal_classifier_forward(
        images, captions, labels, params,
        prefix_len=P, eos_token=EOS, num_classes=C)
    jax.block_until_ready((loss, probs))

    # ---- Pure-JAX f32 reference (generous tol for bf16 path / approx recip)
    pooled = images.reshape(B, Cimg, H * W).mean(axis=-1)
    feat = pooled @ params["W_enc"] + params["b_enc"]
    img_ref = (feat @ params["W_proj"] + params["b_proj"]).reshape(B, P, D)
    text_ref = jnp.take(params["word_emb"], captions[:, :-P], axis=0)
    hs_ref = jnp.concatenate([img_ref, text_ref], axis=1)
    wr = (captions != EOS).astype(jnp.float32)
    wr = wr - jnp.concatenate([wr[:, 1:], jnp.zeros((B, 1), jnp.float32)], axis=1)
    wr = jnp.concatenate([jnp.zeros((B, P), jnp.float32), wr[:, :-P]], axis=1)
    ce_ref = jnp.einsum("bsd,bs->bd", hs_ref, wr)
    logits_ref = ce_ref @ params["W_cls"] + params["b_cls"]
    probs_ref = jax.nn.softmax(logits_ref, axis=-1)
    lse_ref = jax.scipy.special.logsumexp(logits_ref, axis=-1)
    loss_ref = jnp.mean(
        lse_ref - jnp.take_along_axis(logits_ref, labels[:, None], axis=1)[:, 0])

    # Explicit check of the ImagePrefix kernel (its output has zero pooling
    # weight under the identity-LM stub, so check it directly).
    img_chk = image_prefix_forward(
        images, params["W_enc"], params["b_enc"],
        params["W_proj"], params["b_proj"]).astype(jnp.float32).reshape(B, P, D)
    assert bool(jnp.allclose(img_chk, img_ref, atol=1e-2, rtol=1e-2))

    assert probs.shape == (B, C)
    assert bool(jnp.all(jnp.isfinite(probs))) and bool(jnp.isfinite(loss))
    assert bool(jnp.allclose(jnp.sum(probs, axis=-1), 1.0, atol=1e-2))
    assert bool(jnp.allclose(probs, probs_ref, atol=2e-2))
    assert abs(float(loss) - float(loss_ref)) < 5e-2
    print("KERNEL_OK")
</pallas_src>

<mosaic_0001>
module attributes {stable_mosaic.version = 11 : i64} {
  func.func @_image_prefix_kernel(%arg0: i32, %arg1: memref<8x4x256xf32, #tpu.memory_space<vmem>>, %arg2: memref<4x512xf32, #tpu.memory_space<vmem>>, %arg3: memref<1x512xf32, #tpu.memory_space<vmem>>, %arg4: memref<8x512xbf16, #tpu.memory_space<vmem>>) attributes {dimension_semantics = [#tpu.dimension_semantics<parallel>], iteration_bounds = array<i64: 2>, scalar_prefetch = 0 : i64, scratch_operands = 0 : i64, tpu.core_type = #tpu.core_type<tc>, window_params = [{transform_indices = @transform_0, window_bounds = array<i64: 8, 4, 256>}, {pipeline_mode = #tpu.pipeline_mode<synchronous>, transform_indices = @transform_1, window_bounds = array<i64: 4, 512>}, {pipeline_mode = #tpu.pipeline_mode<synchronous>, transform_indices = @transform_2, window_bounds = array<i64: 1, 512>}, {transform_indices = @transform_3, window_bounds = array<i64: 8, 512>}]} {
    %c0 = arith.constant 0 : index
    %c0_0 = arith.constant 0 : index
    %c0_1 = arith.constant 0 : index
    %0 = vector.load %arg1[%c0, %c0_0, %c0_1] : memref<8x4x256xf32, #tpu.memory_space<vmem>>, vector<8x4x256xf32>
    %cst = arith.constant dense<0.000000e+00> : vector<8x4xf32>
    %1 = vector.multi_reduction <add>, %0, %cst [2] : vector<8x4x256xf32> to vector<8x4xf32>
    %2 = vector.shape_cast %1 : vector<8x4xf32> to vector<8x4x1xf32>
    %cst_2 = arith.constant 3.906250e-03 : f32
    %3 = vector.broadcast %cst_2 : f32 to vector<8x4x1xf32>
    %4 = arith.mulf %2, %3 : vector<8x4x1xf32>
    %c0_3 = arith.constant 0 : index
    %c0_4 = arith.constant 0 : index
    %5 = vector.load %arg2[%c0_3, %c0_4] : memref<4x512xf32, #tpu.memory_space<vmem>>, vector<4x512xf32>
    %cst_5 = arith.constant 0.000000e+00 : f32
    %6 = vector.broadcast %cst_5 : f32 to vector<8x512xf32>
    %c0_6 = arith.constant 0 : index
    %c0_7 = arith.constant 0 : index
    %7 = vector.load %arg3[%c0_6, %c0_7] : memref<1x512xf32, #tpu.memory_space<vmem>>, vector<1x512xf32>
    %8 = vector.broadcast %7 : vector<1x512xf32> to vector<8x512xf32>
    %9 = arith.addf %6, %8 : vector<8x512xf32>
    %10 = vector.extract_strided_slice %4 {offsets = [0, 0, 0], sizes = [8, 1, 1], strides = [1, 1, 1]} : vector<8x4x1xf32> to vector<8x1x1xf32>
    %11 = vector.shape_cast %10 : vector<8x1x1xf32> to vector<8x1xf32>
    %12 = vector.extract_strided_slice %5 {offsets = [0, 0], sizes = [1, 512], strides = [1, 1]} : vector<4x512xf32> to vector<1x512xf32>
    %13 = vector.broadcast %11 : vector<8x1xf32> to vector<8x512xf32>
    %14 = vector.broadcast %12 : vector<1x512xf32> to vector<8x512xf32>
    %15 = arith.mulf %13, %14 : vector<8x512xf32>
    %16 = arith.addf %9, %15 : vector<8x512xf32>
    %17 = vector.extract_strided_slice %4 {offsets = [0, 1, 0], sizes = [8, 1, 1], strides = [1, 1, 1]} : vector<8x4x1xf32> to vector<8x1x1xf32>
    %18 = vector.shape_cast %17 : vector<8x1x1xf32> to vector<8x1xf32>
    %19 = vector.extract_strided_slice %5 {offsets = [1, 0], sizes = [1, 512], strides = [1, 1]} : vector<4x512xf32> to vector<1x512xf32>
    %20 = vector.broadcast %18 : vector<8x1xf32> to vector<8x512xf32>
    %21 = vector.broadcast %19 : vector<1x512xf32> to vector<8x512xf32>
    %22 = arith.mulf %20, %21 : vector<8x512xf32>
    %23 = arith.addf %16, %22 : vector<8x512xf32>
    %24 = vector.extract_strided_slice %4 {offsets = [0, 2, 0], sizes = [8, 1, 1], strides = [1, 1, 1]} : vector<8x4x1xf32> to vector<8x1x1xf32>
    %25 = vector.shape_cast %24 : vector<8x1x1xf32> to vector<8x1xf32>
    %26 = vector.extract_strided_slice %5 {offsets = [2, 0], sizes = [1, 512], strides = [1, 1]} : vector<4x512xf32> to vector<1x512xf32>
    %27 = vector.broadcast %25 : vector<8x1xf32> to vector<8x512xf32>
    %28 = vector.broadcast %26 : vector<1x512xf32> to vector<8x512xf32>
    %29 = arith.mulf %27, %28 : vector<8x512xf32>
    %30 = arith.addf %23, %29 : vector<8x512xf32>
    %31 = vector.extract_strided_slice %4 {offsets = [0, 3, 0], sizes = [8, 1, 1], strides = [1, 1, 1]} : vector<8x4x1xf32> to vector<8x1x1xf32>
    %32 = vector.shape_cast %31 : vector<8x1x1xf32> to vector<8x1xf32>
    %33 = vector.extract_strided_slice %5 {offsets = [3, 0], sizes = [1, 512], strides = [1, 1]} : vector<4x512xf32> to vector<1x512xf32>
    %34 = vector.broadcast %32 : vector<8x1xf32> to vector<8x512xf32>
    %35 = vector.broadcast %33 : vector<1x512xf32> to vector<8x512xf32>
    %36 = arith.mulf %34, %35 : vector<8x512xf32>
    %37 = arith.addf %30, %36 : vector<8x512xf32>
    %38 = arith.truncf %37 : vector<8x512xf32> to vector<8x512xbf16>
    %c0_8 = arith.constant 0 : index
    %c0_9 = arith.constant 0 : index
    %39 = vector.load %arg4[%c0_8, %c0_9] : memref<8x512xbf16, #tpu.memory_space<vmem>>, vector<8x512xbf16>
    tpu.vector_store %arg4[%c0_8, %c0_9], %38 {strides = array<i32>} : memref<8x512xbf16, #tpu.memory_space<vmem>>, vector<8x512xbf16>,
    return
  }
  func.func @transform_0(%arg0: i32) -> (i32, i32, i32) {
    %c0_i32 = arith.constant 0 : i32
    %c0_i32_0 = arith.constant 0 : i32
    %c0_i32_1 = arith.constant 0 : i32
    return %arg0, %c0_i32, %c0_i32_0 : i32, i32, i32
  }
  func.func @transform_1(%arg0: i32) -> (i32, i32) {
    %c0_i32 = arith.constant 0 : i32
    %c0_i32_0 = arith.constant 0 : i32
    %c0_i32_1 = arith.constant 0 : i32
    return %c0_i32, %c0_i32_0 : i32, i32
  }
  func.func @transform_2(%arg0: i32) -> (i32, i32) {
    %c0_i32 = arith.constant 0 : i32
    %c0_i32_0 = arith.constant 0 : i32
    %c0_i32_1 = arith.constant 0 : i32
    return %c0_i32, %c0_i32_0 : i32, i32
  }
  func.func @transform_3(%arg0: i32) -> (i32, i32) {
    %c0_i32 = arith.constant 0 : i32
    %c0_i32_0 = arith.constant 0 : i32
    return %arg0, %c0_i32 : i32, i32
  }
}

</mosaic_0001>

<bundles_post_ra>
// kernel: tpu_custom_call.1
= control target key start
LH: loop header
LB: loop body
LE: loop exit
PB: predicated region body
PF: predicated region fallthrough
CT: control target
= control target key end

     0   :  { %8 = vsyncpa [#allocation3], 0  ;;  %s2002_s0 = inlined_call_operand.hbm [shape: f32[16,4,256], index: 0, kind: input, shape index: {}]   ;;  %s2003_s1 = inlined_call_operand.hbm [shape: f32[4,512], index: 1, kind: input, shape index: {}]   ;;  %s2004_s2 = inlined_call_operand.hbm [shape: f32[1,512], index: 2, kind: input, shape index: {}]   ;;  %s2005_s3 = inlined_call_operand.hbm [shape: bf16[16,512], index: 3, kind: output, shape index: {}]  }
   0x1   :  { %10 = vsyncpa [#allocation3 + $0x1], 0 }
   0x2   :  { %11 = vsyncpa [#allocation6], 0 }
   0x3   :  { %12 = vsyncpa [#allocation4], 0 }
   0x4   :  { %14 = vsyncpa [#allocation4 + $0x1], 0  ;;  %s1302_s12 = smov 0   ;;  %s1304_s13 = smov 0  }
   0x5   :  { %s1306_s14 = smov 0   ;;  %s1308_s15 = smov 0  }
   0x6 LB: > { %s1323_s16 = sadd.s32 4294967295, %s1276_s15   ;;  %s1025_s17 = sadd.s32 4294967294, %s1276_s15   ;;  %s1276_s15 = sphi %s1308_s15, %s2017_s15   ;;  %s1272_s14 = sphi %s1306_s14, %s2016_s14   ;;  %s1268_s13 = sphi %s1304_s13, %s2015_s13   ;;  %s1264_s12 = sphi %s1302_s12, %s2014_s12  }
   0x7   : > { %s1327_s18 = sadd.s32 1, %s1276_s15   ;;  %s27_s19 = sadd.s32 1, %s1272_s14 }
   0x8   : > { %s24_s20 = ssub.s32 %s1276_s15, %s1327_s18  ;;  %p34_p0 = scmp.ne.s32.totalorder %s1272_s14, %s1268_s13 }
   0x9   : > { %p25_p1 = scmp.eq.s32.totalorder %s24_s20, 0  ;;  %p35_p2 = scmp.eq.s32.totalorder %s1276_s15, 0 }
   0xa   : > { %p40_p3 = scmp.ne.s32.totalorder %s1268_s13, %s1264_s12  ;;  %p41_p4 = scmp.eq.s32.totalorder %s1323_s16, 0 }
   0xb   : > { %s1339_s21 = scalar_select %p25_p1, %s1272_s14, %s27_s19  }
   0xc   : > { %p1341_p5 = por %p35_p2, %p34_p0  ;;  %p1347_p6 = por %p41_p4, %p40_p3 }
   0xd   : > { %p106_p7 = scmp.eq.s32.totalorder %s1323_s16, 1  ;;  %p112_p8 = scmp.eq.s32.totalorder %s1025_s17, 1 }
   0xe   : > { %p1026_p9 = scmp.ge.s32.totalorder %s1276_s15, 1  ;;  %p119_p10 = scmp.lt.s32.totalorder %s1276_s15, 3 }
   0xf   : > { %p1354_p11 = por %p106_p7, %p34_p0  ;;  %p1358_p12 = por %p112_p8, %p40_p3 }
  0x10   : > { %p1362_p13 = pnand %p1026_p9, %p119_p10  ;;  %s131_s29 = sshll.u32 %s2003_s1, 4  ;;  %s132_s29 = int_to_ptr.hbm [resolvable:$true] %s131_s29 }
  0x11   : > { %s1278_s30 = smov [#allocation5]   ;;  %p1076_p3 = scmp.lt.s32.totalorder %s1276_s15, 2 }
  0x12   : > { %p1059_p1 = pneg %p1362_p13  ;;  %s133_s4 = sshll.u32 %s1278_s30, 4  ;;  %s134_s4 = int_to_ptr.vmem [resolvable:$true] %s133_s4 }
  0x13   : > { %s143_s7 = sshll.u32 %s2004_s2, 4  ;;  %p1380_p7 = pnand %p1076_p3, %p1341_p5  ;;  %s144_s7 = int_to_ptr.hbm [resolvable:$true] %s143_s7 }
  0x14   : > { %p1060_p2 = pnand %p1059_p1, %p41_p4  ;;  %s1279_s9 = smov [#allocation7]  }
  0x15   : > { %s145_s10 = sshll.u32 %s1279_s9, 4  ;;  %s156_s11 = sand.u32 1, %s1272_s14   ;;  %s146_s10 = int_to_ptr.vmem [resolvable:$true] %s145_s10 }
  0x16   : > { %1062 = dma.hbm_to_vmem [thread:$0]  (!%p1060_p2), %s132_s29, 256, %s134_s4, [#allocation6]  }
  0x17   : > { %1065 = dma.hbm_to_vmem [thread:$0]  (!%p1060_p2), %s144_s7, 64, %s146_s10, [#allocation6]  }
  0x18   : > { %s1030_s17 = sshll.u32 %s156_s11, 6  ;;  %s1045_s19 = sshll.u32 %s1276_s15, 6 }
  0x19   : > { %s166_s28 = scalar_lea.hbm %s2002_s0, %s1045_s19  ;;  %s160_s30 = scalar_lea.vmem [#allocation2], %s1030_s17 }
  0x1a   : > { %s169_s5 = sshll.u32 %s160_s30, 4  ;;  %s167_s29 = sshll.u32 %s166_s28, 4  ;;  %s170_s5 = int_to_ptr.vmem [resolvable:$true] %s169_s5  ;;  %s168_s29 = int_to_ptr.hbm [resolvable:$true] %s167_s29 }
  0x1b   : > { %s157_s22 = scalar_lea.sflag [#allocation3], %s156_s11  ;;  %s1176_s4 = sshra.s32 %s168_s29, 4  ;;  %s1177_s4 = int_to_ptr.hbm [resolvable:$true] %s1176_s4 }
  0x1c   : > { %s1178_s6 = scalar_lea.hbm %s1177_s4, 64  ;;  %p1180_p8 = pneg %p1380_p7 }
  0x1d   : > { %p1179_p5 = scmp.ne.s32.totalorder %s1177_s4, %s1178_s6  ;;  %s1183_s10 = scalar_lea.hbm %s2002_s0, 128 }
  0x1e   : > { %p1184_p1 = scmp.lt.s32.totalorder %s1177_s4, %s2002_s0  ;;  %p1185_p2 = scmp.lt.s32.totalorder %s1183_s10, %s1178_s6 }
  0x1f   : > { %p1181_p9 = pnand %p1180_p8, %p1179_p5 }
  0x20   : > { %p1186_p3 = por %p1185_p2, %p1184_p1 }
  0x21   : > { %p1182_p10 = pneg %p1181_p9 }
  0x23   : > { %p1187_p0 = pnand %p1186_p3, %p1182_p10 }
  0x25   : > { %1190 = shalt.err (!%p1187_p0)
}
  0x26   : > { %s1280_s11 = smov 128   ;;  %s1281_s17 = smov 8  }
  0x27   : > { %1069 = dma.hbm_to_vmem [thread:$0]  (!%p1380_p7), %s168_s29, 1024, %s170_s5, %s157_s22, %s1280_s11, %s1280_s11, %s1281_s17  }
  0x28   : > { %181 = sbr.rel (%p1362_p13) target bundleno = 286 (0x11e), region = 32  ;;  %s1402_s27 = sand.u32 (!%p1362_p13), 1, %s1268_s13  }
  0x29   : > { %s1035_s28 = sshll.u32 (!%p1362_p13), %s1402_s27, 6  ;;  %s184_s30 = scalar_lea.sflag (!%p1362_p13), [#allocation3], %s1402_s27 }
  0x2a   : > { %s187_s4 = scalar_lea.vmem (!%p1362_p13), [#allocation2], %s1035_s28 }
  0x2d   : > { %1251 = dma.done.wait (%p1347_p6), %s184_s30, 1024  }
  0x2e   : > { %1253 = vsyncadd (%p1347_p6), %s184_s30, 4294966272 }
  0x2f   : > { %1255 = dma.done.wait (%p41_p4), [#allocation6], 320  }
  0x30   : > { %1257 = vsyncadd (%p41_p4), [#allocation6], 4294966976  ;;  %v223_v0 = vld [vmem:[%s187_s4 + $0x8] sm:$0xff]  ;;  %v222_v1 = vld [vmem:[%s187_s4] sm:$0xff]  ;;  %vm281_vm0 = vcmask 1043456   ;;  %vm425_vm1 = vcmask 1041409  }
  0x31   : > { %242 = vst [vmem:[#allocation1 + $0x10] ss:$2 sm:$0xff] %v223_v0  ;;  %v224_v2 = vld [vmem:[%s187_s4 + $0x10] sm:$0xff]  ;;  %v225_v3 = vld [vmem:[%s187_s4 + $0x18] sm:$0xff]  ;;  %v227_v4 = vld [vmem:[%s187_s4 + $0x28] sm:$0xff]  ;;  %vm431_vm2 = vcmask 1043459  }
  0x32   : > { %238 = vst [vmem:[#allocation1] ss:$2 sm:$0xff] %v222_v1  ;;  %v226_v5 = vld [vmem:[%s187_s4 + $0x20] sm:$0xff]  ;;  %v228_v10 = vld [vmem:[%s187_s4 + $0x30] sm:$0xff]  ;;  %v229_v16 = vld [vmem:[%s187_s4 + $0x38] sm:$0xff]  ;;  %vm428_vm3 = vcmask 1042434  }
  0x33   : > { %246 = vst [vmem:[#allocation1 + $0x20] ss:$2 sm:$0xff] %v224_v2  ;;  %v1430_v48 = vld [vmem:[#allocation5] sm:$0xff]  ;;  %v1432_v49 = vld [vmem:[#allocation5 + $0x8] sm:$0xff]  ;;  %v1452_v0 = vld [vmem:[#allocation7] sm:$0xf] }
  0x34   : > { %250 = vst [vmem:[#allocation1 + $0x30] ss:$2 sm:$0xff] %v225_v3  ;;  %v348_v50 = vperm.slane %v1430_v48, 0  ;;  %v349_v51 = vperm.slane %v1430_v48, 4  ;;  %v350_v52 = vperm.slane %v1432_v49, 0  ;;  %v351_v53 = vperm.slane %v1432_v49, 4 }
  0x35   : > { %v495_v54 = vperm.slane %v1430_v48, 1  ;;  %v496_v55 = vperm.slane %v1430_v48, 5  ;;  %v497_v56 = vperm.slane %v1432_v49, 1  ;;  %v498_v62 = vperm.slane %v1432_v49, 5  ;;  %s1038_s23 = sshll.u32 %s1402_s27, 4  ;;  %s1046_s26 = sshll.u32 %s1323_s16, 4 }
  0x36   : > { %v1441_v57 = vperm.slane %v348_v50, 0  ;;  %v1443_v58 = vperm.slane %v349_v51, 0  ;;  %v1445_v59 = vperm.slane %v350_v52, 0  ;;  %v1447_v61 = vperm.slane %v351_v53, 0  ;;  %s931_s5 = scalar_lea.hbm %s2005_s3, %s1046_s26  ;;  %s220_s29 = scalar_lea.vmem [#allocation8], %s1038_s23 }
  0x37   : > { %v1454_v2 = vperm.slane %v495_v54, 1  ;;  %v1456_v3 = vperm.slane %v496_v55, 1  ;;  %vm434_vm4 = vcmask 1044484   ;;  %vm437_vm5 = vcmask 1045509   ;;  %s933_s22 = sshll.u32 %s220_s29, 4  ;;  %s935_s6 = sshll.u32 %s931_s5, 4  ;;  %s934_s22 = int_to_ptr.vmem [resolvable:$true] %s933_s22  ;;  %s936_s6 = int_to_ptr.hbm [resolvable:$true] %s935_s6 }
  0x38   : > { %v243_v6 = vld.sshfl [vmem:[#allocation1 + $0x10] sm:$0xff pattern:$0x75316420]  ;;  %v244_v7 = vld.sshfl [vmem:[#allocation1 + $0x18] sm:$0xff pattern:$0x75316420] }
  0x39   : > { %v287_v8 = vsel %vm281_vm0, %v243_v6, 0.0  ;;  %v288_v9 = vsel %vm281_vm0, %v244_v7, 0.0  ;;  %256 = vst [vmem:[#allocation1 + $0x10] ss:$2 sm:$0xff] %v227_v4  ;;  %v1458_v4 = vperm.slane %v497_v56, 1  ;;  %vm440_vm6 = vcmask 1046534  }
  0x3a   : > { %v289_v11 = vadd.f32 %v288_v9, %v287_v8  ;;  %v239_v12 = vld.sshfl [vmem:[#allocation1] sm:$0xff pattern:$0x75316420]  ;;  %v240_v13 = vld.sshfl [vmem:[#allocation1 + $0x8] sm:$0xff pattern:$0x75316420] }
  0x3b   : > { %v282_v14 = vsel %vm281_vm0, %v239_v12, 0.0  ;;  %v283_v15 = vsel %vm281_vm0, %v240_v13, 0.0  ;;  %253 = vst [vmem:[#allocation1] ss:$2 sm:$0xff] %v226_v5  ;;  %v334_v9 = vperm.slane %v1452_v0, 0  ;;  %v1472_v12 = vperm.slane %v498_v62, 1 }
  0x3c   : > { %290 = vadd.xlane.f32.xlu0 %v289_v11  ;;  %v284_v17 = vadd.f32 %v283_v15, %v282_v14  ;;  %v247_v18 = vld.sshfl [vmem:[#allocation1 + $0x20] sm:$0xff pattern:$0x75316420]  ;;  %v248_v19 = vld.sshfl [vmem:[#allocation1 + $0x28] sm:$0xff pattern:$0x75316420] }
  0x3d   : > { %259 = vst [vmem:[#allocation1 + $0x20] ss:$2 sm:$0xff] %v228_v10  ;;  %v292_v20 = vsel %vm281_vm0, %v247_v18, 0.0  ;;  %v293_v21 = vsel %vm281_vm0, %v248_v19, 0.0  ;;  %v335_v10 = vperm.slane %v1452_v0, 1  ;;  %vm443_vm7 = vcmask 1047559  }
  0x3e   : > { %285 = vadd.xlane.f32.xlu1 %v284_v17  ;;  %v251_v22 = vld.sshfl [vmem:[#allocation1 + $0x30] sm:$0xff pattern:$0x75316420]  ;;  %v252_v23 = vld.sshfl [vmem:[#allocation1 + $0x38] sm:$0xff pattern:$0x75316420]  ;;  %v294_v26 = vadd.f32 %v293_v21, %v292_v20 }
  0x3f   : > { %262 = vst [vmem:[#allocation1 + $0x30] ss:$2 sm:$0xff] %v229_v16  ;;  %v297_v24 = vsel %vm281_vm0, %v251_v22, 0.0  ;;  %v298_v25 = vsel %vm281_vm0, %v252_v23, 0.0  ;;  %v336_v21 = vperm.slane %v1452_v0, 2  ;;  %v337_v22 = vperm.slane %v1452_v0, 3 }
  0x40   : > { %v299_v27 = vadd.f32 %v298_v25, %v297_v24  ;;  %v257_v30 = vld.sshfl [vmem:[#allocation1 + $0x10] sm:$0xff pattern:$0x75316420]  ;;  %v258_v33 = vld.sshfl [vmem:[#allocation1 + $0x18] sm:$0xff pattern:$0x75316420] }
  0x41   : > { %v307_v41 = vsel %vm281_vm0, %v257_v30, 0.0  ;;  %v308_v42 = vsel %vm281_vm0, %v258_v33, 0.0  ;;  %s920_s7 = scalar_lea.sflag [#allocation4], %s1402_s27  ;;  %s1220_s9 = sshra.s32 %s936_s6, 4  ;;  %s1221_s9 = int_to_ptr.hbm [resolvable:$true] %s1220_s9 }
  0x42   : > { %v254_v28 = vld.sshfl [vmem:[#allocation1] sm:$0xff pattern:$0x75316420]  ;;  %v255_v29 = vld.sshfl [vmem:[#allocation1 + $0x8] sm:$0xff pattern:$0x75316420]  ;;  %v309_v46 = vadd.f32 %v308_v42, %v307_v41  ;;  %p1227_p0 = scmp.lt.s32.totalorder %s1221_s9, %s2005_s3 }
  0x43   : > { %v302_v31 = vsel %vm281_vm0, %v254_v28, 0.0  ;;  %v303_v32 = vsel %vm281_vm0, %v255_v29, 0.0  ;;  %s1222_s10 = scalar_lea.hbm %s1221_s9, 16  ;;  %s1226_s11 = scalar_lea.hbm %s2005_s3, 32 }
  0x44   : > { %295 = vadd.xlane.f32.xlu0 %v294_v26  ;;  %v304_v34 = vadd.f32 %v303_v32, %v302_v31  ;;  %v260_v35 = vld.sshfl [vmem:[#allocation1 + $0x20] sm:$0xff pattern:$0x75316420]  ;;  %v261_v36 = vld.sshfl [vmem:[#allocation1 + $0x28] sm:$0xff pattern:$0x75316420]  ;;  %p1223_p4 = scmp.ne.s32.totalorder %s1221_s9, %s1222_s10  ;;  %p1228_p7 = scmp.lt.s32.totalorder %s1226_s11, %s1222_s10 }
  0x45   : > { %v312_v37 = vsel %vm281_vm0, %v260_v35, 0.0  ;;  %v313_v38 = vsel %vm281_vm0, %v261_v36, 0.0 }
  0x46   : > { %300 = vadd.xlane.f32.xlu1 %v299_v27  ;;  %305 = vadd.xlane.f32.xlu2 %v304_v34  ;;  %v263_v39 = vld.sshfl [vmem:[#allocation1 + $0x30] sm:$0xff pattern:$0x75316420]  ;;  %v264_v40 = vld.sshfl [vmem:[#allocation1 + $0x38] sm:$0xff pattern:$0x75316420]  ;;  %v314_v45 = vadd.f32 %v313_v38, %v312_v37  ;;  %p1224_p6 = pnand %p1223_p4, %p1354_p11  ;;  %p1229_p5 = por %p1228_p7, %p1227_p0 }
  0x47   : > { %v317_v43 = vsel %vm281_vm0, %v263_v39, 0.0  ;;  %v318_v44 = vsel %vm281_vm0, %v264_v40, 0.0 }
  0x48   : > { %v319_v47 = vadd.f32 %v318_v44, %v317_v43  ;;  %p1225_p13 = pneg %p1224_p6 }
  0x4a   : > { %p1230_p8 = pnand %p1229_p5, %p1225_p13 }
  0x4c   : > { %315 = vadd.xlane.f32.xlu0 %v314_v45 }
  0x4e   : > { %310 = vadd.xlane.f32.xlu2 %v309_v46  ;;  %320 = vadd.xlane.f32.xlu1 %v319_v47 }
  0xaf   : > { %v291_v60 = vpop.xlane.xlu0 %290 }
  0xb0   : > { %v1450_v63 = vmul.f32 0.00390625, %v291_v60 }
  0xb1   : > { %v286_v1 = vpop.xlane.xlu1 %285 }
  0xb2   : > { %v1460_v5 = vmul.f32 0.00390625, %v286_v1  ;;  %v364_v6 = vmul.f32 %v1441_v57, %v1450_v63  ;;  %v365_v7 = vmul.f32 %v1443_v58, %v1450_v63  ;;  %v366_v8 = vmul.f32 %v1445_v59, %v1450_v63 }
  0xb3   : > { %v367_v11 = vmul.f32 %v1447_v61, %v1450_v63  ;;  %v1490_v24 = vmul.f32 %v1454_v2, %v1450_v63  ;;  %v1502_v28 = vmul.f32 %v1456_v3, %v1450_v63  ;;  %v1506_v29 = vmul.f32 %v1458_v4, %v1450_v63 }
  0xb4   : > { %v360_v13 = vmul.f32 %v1441_v57, %v1460_v5  ;;  %v361_v14 = vmul.f32 %v1443_v58, %v1460_v5  ;;  %v362_v15 = vmul.f32 %v1445_v59, %v1460_v5  ;;  %v363_v16 = vmul.f32 %v1447_v61, %v1460_v5 }
  0xb5   : > { %v424_v17 = vrot.slane %v364_v6, 7  ;;  %v445_v18 = vrot.slane %v365_v7, 7  ;;  %v459_v19 = vrot.slane %v366_v8, 7  ;;  %v473_v20 = vrot.slane %v367_v11, 7 }
  0xb6   : > { %v1486_v23 = vmul.f32 %v1454_v2, %v1460_v5  ;;  %v1494_v26 = vmul.f32 %v1456_v3, %v1460_v5  ;;  %v1498_v27 = vmul.f32 %v1458_v4, %v1460_v5  ;;  %v1514_v33 = vmul.f32 %v1472_v12, %v1460_v5 }
  0xb7   : > { %v296_v25 = vpop.xlane.xlu0 %295  ;;  %v426_v31 = vsel %vm425_vm1, %v424_v17, %v360_v13  ;;  %v446_v32 = vsel %vm425_vm1, %v445_v18, %v361_v14  ;;  %v460_v36 = vsel %vm425_vm1, %v459_v19, %v362_v15  ;;  %v1518_v37 = vsel %vm425_vm1, %v473_v20, %v363_v16 }
  0xb8   : > { %v1508_v30 = vmul.f32 0.00390625, %v296_v25  ;;  %v1522_v38 = vmul.f32 %v1472_v12, %v1450_v63  ;;  %v571_v39 = vrot.slane %v1486_v23, 1  ;;  %v585_v46 = vrot.slane %v1494_v26, 1 }
  0xb9   : > { %v301_v34 = vpop.xlane.xlu1 %300  ;;  %v306_v35 = vpop.xlane.xlu2 %305  ;;  %v2012_v26 = vrot.slane %v1498_v27, 1 }
  0xba   : > { %v1525_v40 = vmul.f32 0.00390625, %v301_v34  ;;  %v1527_v41 = vmul.f32 0.00390625, %v306_v35  ;;  %v368_v42 = vmul.f32 %v1441_v57, %v1508_v30  ;;  %v369_v43 = vmul.f32 %v1443_v58, %v1508_v30 }
  0xbb   : > { %v370_v44 = vmul.f32 %v1445_v59, %v1508_v30  ;;  %v1537_v45 = vmul.f32 %v1447_v61, %v1508_v30 }
  0xbc   : > { %v372_v50 = vmul.f32 %v1441_v57, %v1525_v40  ;;  %v373_v51 = vmul.f32 %v1443_v58, %v1525_v40  ;;  %v374_v52 = vmul.f32 %v1445_v59, %v1525_v40  ;;  %v1549_v53 = vmul.f32 %v1447_v61, %v1525_v40 }
  0xbd   : > { %v376_v54 = vmul.f32 %v1441_v57, %v1527_v41  ;;  %v377_v55 = vmul.f32 %v1443_v58, %v1527_v41  ;;  %v378_v56 = vmul.f32 %v1445_v59, %v1527_v41  ;;  %v1559_v60 = vmul.f32 %v1447_v61, %v1527_v41 }
  0xbe   : > { %v427_v62 = vrot.slane %v368_v42, 6  ;;  %v430_v1 = vrot.slane %v372_v50, 5  ;;  %v447_v6 = vrot.slane %v369_v43, 6  ;;  %v449_v7 = vrot.slane %v373_v51, 5 }
  0xbf   : > { %v316_v8 = vpop.xlane.xlu0 %315  ;;  %v433_v11 = vrot.slane %v376_v54, 4  ;;  %v451_v13 = vrot.slane %v377_v55, 4  ;;  %v461_v14 = vrot.slane %v370_v44, 6  ;;  %v463_v15 = vrot.slane %v374_v52, 5 }
  0xc0   : > { %v1561_v16 = vmul.f32 0.00390625, %v316_v8  ;;  %v429_v17 = vsel %vm428_vm3, %v427_v62, %v426_v31  ;;  %v448_v18 = vsel %vm428_vm3, %v447_v6, %v446_v32  ;;  %v465_v19 = vrot.slane %v378_v56, 4 }
  0xc1   : > { %v311_v20 = vpop.xlane.xlu2 %310  ;;  %v321_v25 = vpop.xlane.xlu1 %320  ;;  %v432_v34 = vsel %vm431_vm2, %v430_v1, %v429_v17  ;;  %v450_v35 = vsel %vm431_vm2, %v449_v7, %v448_v18  ;;  %v462_v42 = vsel %vm428_vm3, %v461_v14, %v460_v36  ;;  %v475_v43 = vrot.slane %v1537_v45, 6 }
  0xc2   : > { %v1569_v50 = vmul.f32 0.00390625, %v311_v20  ;;  %v1571_v44 = vmul.f32 0.00390625, %v321_v25  ;;  %v384_v31 = vmul.f32 %v1441_v57, %v1561_v16  ;;  %v385_v32 = vmul.f32 %v1443_v58, %v1561_v16 }
  0xc3   : > { %v386_v51 = vmul.f32 %v1445_v59, %v1561_v16  ;;  %v387_v52 = vmul.f32 %v1447_v61, %v1561_v16  ;;  %v435_v36 = vsel %vm434_vm4, %v433_v11, %v432_v34  ;;  %v452_v45 = vsel %vm434_vm4, %v451_v13, %v450_v35 }
  0xc4   : > { %v380_v54 = vmul.f32 %v1441_v57, %v1569_v50  ;;  %v381_v55 = vmul.f32 %v1443_v58, %v1569_v50  ;;  %v382_v56 = vmul.f32 %v1445_v59, %v1569_v50  ;;  %v383_v62 = vmul.f32 %v1447_v61, %v1569_v50 }
  0xc5   : > { %v388_v1 = vmul.f32 %v1441_v57, %v1571_v44  ;;  %v389_v6 = vmul.f32 %v1443_v58, %v1571_v44  ;;  %v390_v7 = vmul.f32 %v1445_v59, %v1571_v44  ;;  %v391_v8 = vmul.f32 %v1447_v61, %v1571_v44 }
  0xc6   : > { %v436_v11 = vrot.slane %v380_v54, 3  ;;  %v439_v13 = vrot.slane %v384_v31, 2  ;;  %v453_v14 = vrot.slane %v381_v55, 3  ;;  %v455_v17 = vrot.slane %v385_v32, 2 }
  0xc7   : > { %v442_v18 = vrot.slane %v388_v1, 1  ;;  %v457_v20 = vrot.slane %v389_v6, 1  ;;  %v464_v25 = vsel %vm431_vm2, %v463_v15, %v462_v42  ;;  %v467_v34 = vrot.slane %v382_v56, 3 }
  0xc8   : > { %v438_v57 = vsel %vm437_vm5, %v436_v11, %v435_v36  ;;  %v454_v35 = vsel %vm437_vm5, %v453_v14, %v452_v45  ;;  %v466_v58 = vsel %vm434_vm4, %v465_v19, %v464_v25  ;;  %v469_v47 = vrot.slane %v386_v51, 2 }
  0xc9   : > { %v441_v59 = vsel %vm440_vm6, %v439_v13, %v438_v57  ;;  %v456_v61 = vsel %vm440_vm6, %v455_v17, %v454_v35  ;;  %v468_v31 = vsel %vm437_vm5, %v467_v34, %v466_v58  ;;  %v471_v54 = vrot.slane %v390_v7, 1 }
  0xca   : > { %v444_v32 = vsel %vm443_vm7, %v442_v18, %v441_v59  ;;  %v470_v55 = vsel %vm440_vm6, %v469_v47, %v468_v31  ;;  %v476_v15 = vsel %vm428_vm3, %v475_v43, %v1518_v37  ;;  %v613_v42 = vrot.slane %v1514_v33, 1 }
  0xcb   : > { %v458_v36 = vsel %vm443_vm7, %v457_v20, %v456_v61  ;;  %v472_v19 = vsel %vm443_vm7, %v471_v54, %v470_v55  ;;  %v477_v51 = vrot.slane %v1549_v53, 5  ;;  %v481_v45 = vrot.slane %v383_v62, 3 }
  0xcc   : > { %v479_v56 = vrot.slane %v1559_v60, 4  ;;  %v483_v1 = vrot.slane %v387_v52, 2  ;;  %v635_v6 = vperm.slane %v1430_v48, 2  ;;  %v636_v7 = vperm.slane %v1430_v48, 6 }
  0xcd   : > { %v478_v47 = vsel %vm431_vm2, %v477_v51, %v476_v15  ;;  %v485_v11 = vrot.slane %v391_v8, 1  ;;  %v515_v37 = vmul.f32 %v1454_v2, %v1508_v30  ;;  %v516_v43 = vmul.f32 %v1456_v3, %v1508_v30 }
  0xce   : > { %v480_v13 = vsel %vm434_vm4, %v479_v56, %v478_v47  ;;  %v1625_v53 = vadd.f32 %v444_v32, %v334_v9  ;;  %v1629_v60 = vadd.f32 %v458_v36, %v335_v10  ;;  %v1633_v52 = vadd.f32 %v472_v19, %v336_v21 }
  0xcf   : > { %v482_v62 = vsel %vm437_vm5, %v481_v45, %v480_v13  ;;  %v517_v8 = vmul.f32 %v1458_v4, %v1508_v30  ;;  %v1640_v14 = vmul.f32 %v1472_v12, %v1508_v30  ;;  %v519_v9 = vmul.f32 %v1454_v2, %v1525_v40 }
  0xd0   : > { %v484_v17 = vsel %vm440_vm6, %v483_v1, %v482_v62  ;;  %v520_v10 = vmul.f32 %v1456_v3, %v1525_v40  ;;  %v521_v21 = vmul.f32 %v1458_v4, %v1525_v40  ;;  %v1651_v18 = vmul.f32 %v1472_v12, %v1525_v40 }
  0xd1   : > { %v486_v20 = vsel %vm443_vm7, %v485_v11, %v484_v17  ;;  %v523_v25 = vmul.f32 %v1454_v2, %v1527_v41  ;;  %v524_v34 = vmul.f32 %v1456_v3, %v1527_v41  ;;  %v525_v57 = vmul.f32 %v1458_v4, %v1527_v41 }
  0xd2   : > { %v526_v35 = vmul.f32 %v1472_v12, %v1527_v41  ;;  %v527_v58 = vmul.f32 %v1454_v2, %v1569_v50  ;;  %v528_v59 = vmul.f32 %v1456_v3, %v1569_v50  ;;  %v529_v61 = vmul.f32 %v1458_v4, %v1569_v50 }
  0xd3   : > { %v1670_v31 = vadd.f32 %v486_v20, %v337_v22  ;;  %v530_v54 = vmul.f32 %v1472_v12, %v1569_v50  ;;  %v531_v32 = vmul.f32 %v1454_v2, %v1561_v16  ;;  %v532_v55 = vmul.f32 %v1456_v3, %v1561_v16 }
  0xd4   : > { %v533_v15 = vmul.f32 %v1458_v4, %v1561_v16  ;;  %v534_v36 = vmul.f32 %v1472_v12, %v1561_v16  ;;  %v573_v19 = vrot.slane %v515_v37, 7  ;;  %v575_v51 = vrot.slane %v519_v9, 6 }
  0xd5   : > { %v535_v0 = vmul.f32 %v1454_v2, %v1571_v44  ;;  %v536_v22 = vmul.f32 %v1456_v3, %v1571_v44  ;;  %v537_v45 = vmul.f32 %v1458_v4, %v1571_v44  ;;  %v572_v56 = vsel %vm425_vm1, %v1490_v24, %v571_v39 }
  0xd6   : > { %v574_v1 = vsel %vm428_vm3, %v573_v19, %v572_v56  ;;  %v579_v47 = vrot.slane %v527_v58, 4  ;;  %v587_v11 = vrot.slane %v516_v43, 7  ;;  %v589_v37 = vrot.slane %v520_v10, 6 }
  0xd7   : > { %v576_v13 = vsel %vm431_vm2, %v575_v51, %v574_v1  ;;  %v577_v62 = vrot.slane %v523_v25, 5  ;;  %v586_v2 = vsel %vm425_vm1, %v1502_v28, %v585_v46  ;;  %v593_v3 = vrot.slane %v528_v59, 4 }
  0xd8   : > { %v581_v4 = vrot.slane %v531_v32, 3  ;;  %v588_v23 = vsel %vm428_vm3, %v587_v11, %v586_v2  ;;  %v591_v9 = vrot.slane %v524_v34, 5  ;;  %v595_v17 = vrot.slane %v532_v55, 3 }
  0xd9   : > { %v578_v24 = vsel %vm434_vm4, %v577_v62, %v576_v13  ;;  %v590_v39 = vsel %vm431_vm2, %v589_v37, %v588_v23  ;;  %v601_v43 = vrot.slane %v517_v8, 7  ;;  %v603_v10 = vrot.slane %v521_v21, 6 }
  0xda   : > { %v580_v20 = vsel %vm437_vm5, %v579_v47, %v578_v24  ;;  %v592_v25 = vsel %vm434_vm4, %v591_v9, %v590_v39  ;;  %v600_v28 = vsel %vm425_vm1, %v1506_v29, %v2012_v26  ;;  %v607_v46 = vrot.slane %v529_v61, 4 }
  0xdb   : > { %v538_v34 = vmul.f32 %v1472_v12, %v1571_v44  ;;  %v594_v58 = vsel %vm437_vm5, %v593_v3, %v592_v25  ;;  %v602_v59 = vsel %vm428_vm3, %v601_v43, %v600_v28  ;;  %v605_v32 = vrot.slane %v525_v57, 5 }
  0xdc   : > { %v583_v8 = vrot.slane %v535_v0, 2  ;;  %v597_v21 = vrot.slane %v536_v22, 2  ;;  %v604_v55 = vsel %vm431_vm2, %v603_v10, %v602_v59  ;;  %v609_v19 = vrot.slane %v533_v15, 3 }
  0xdd   : > { %v582_v51 = vsel %vm440_vm6, %v581_v4, %v580_v20  ;;  %v606_v27 = vsel %vm434_vm4, %v605_v32, %v604_v55  ;;  %v615_v29 = vrot.slane %v1640_v14, 7  ;;  %v617_v61 = vrot.slane %v1651_v18, 6 }
  0xde   : > { %v596_v12 = vsel %vm440_vm6, %v595_v17, %v594_v58  ;;  %v608_v56 = vsel %vm437_vm5, %v607_v46, %v606_v27  ;;  %v614_v57 = vsel %vm425_vm1, %v1522_v38, %v613_v42  ;;  %v621_v0 = vrot.slane %v530_v54, 4 }
  0xdf   : > { %v611_v22 = vrot.slane %v537_v45, 2  ;;  %v616_v15 = vsel %vm428_vm3, %v615_v29, %v614_v57  ;;  %v619_v1 = vrot.slane %v526_v35, 5  ;;  %v623_v47 = vrot.slane %v534_v36, 3 }
  0xe0   : > { %v584_v11 = vsel %vm443_vm7, %v583_v8, %v582_v51  ;;  %v610_v14 = vsel %vm440_vm6, %v609_v19, %v608_v56  ;;  %v618_v18 = vsel %vm431_vm2, %v617_v61, %v616_v15  ;;  %v637_v37 = vperm.slane %v1432_v49, 2 }
  0xe1   : > { %v620_v13 = vsel %vm434_vm4, %v619_v1, %v618_v18  ;;  %v625_v33 = vrot.slane %v538_v34, 2  ;;  %v638_v62 = vperm.slane %v1432_v49, 6  ;;  %v643_v38 = vperm.slane %v635_v6, 2 }
  0xe2   : > { %v598_v42 = vsel %vm443_vm7, %v597_v21, %v596_v12  ;;  %v622_v35 = vsel %vm437_vm5, %v621_v0, %v620_v13  ;;  %v644_v54 = vperm.slane %v636_v7, 2  ;;  %v1735_v36 = vperm.slane %v637_v37, 2 }
  0xe3   : > { %v612_v45 = vsel %vm443_vm7, %v611_v22, %v610_v14  ;;  %v624_v2 = vsel %vm440_vm6, %v623_v47, %v622_v35  ;;  %v1740_v3 = vadd.f32 %v584_v11, %v1625_v53  ;;  %v1742_v4 = vperm.slane %v638_v62, 2 }
  0xe4   : > { %v1745_v6 = vadd.f32 %v598_v42, %v1629_v60  ;;  %v1748_v23 = vadd.f32 %v612_v45, %v1633_v52  ;;  %v647_v9 = vmul.f32 %v643_v38, %v1460_v5  ;;  %v775_v7 = vperm.slane %v1430_v48, 3 }
  0xe5   : > { %v1753_v17 = vsel %vm443_vm7, %v625_v33, %v624_v2  ;;  %v648_v24 = vmul.f32 %v644_v54, %v1460_v5  ;;  %v649_v53 = vmul.f32 %v1735_v36, %v1460_v5  ;;  %v651_v39 = vmul.f32 %v643_v38, %v1450_v63 }
  0xe6   : > { %v1761_v60 = vmul.f32 %v1742_v4, %v1460_v5  ;;  %v652_v52 = vmul.f32 %v644_v54, %v1450_v63  ;;  %v653_v43 = vmul.f32 %v1735_v36, %v1450_v63  ;;  %v1768_v10 = vmul.f32 %v1742_v4, %v1450_v63 }
  0xe7   : > { %v655_v20 = vmul.f32 %v643_v38, %v1508_v30  ;;  %v656_v25 = vmul.f32 %v644_v54, %v1508_v30  ;;  %v657_v26 = vmul.f32 %v1735_v36, %v1508_v30  ;;  %v1776_v28 = vmul.f32 %v1742_v4, %v1508_v30 }
  0xe8   : > { %v659_v46 = vmul.f32 %v643_v38, %v1525_v40  ;;  %v660_v34 = vmul.f32 %v644_v54, %v1525_v40  ;;  %v661_v58 = vmul.f32 %v1735_v36, %v1525_v40  ;;  %v1784_v59 = vmul.f32 %v1742_v4, %v1525_v40 }
  0xe9   : > { %v663_v32 = vmul.f32 %v643_v38, %v1527_v41  ;;  %v664_v8 = vmul.f32 %v644_v54, %v1527_v41  ;;  %v665_v21 = vmul.f32 %v1735_v36, %v1527_v41  ;;  %v667_v55 = vmul.f32 %v643_v38, %v1569_v50 }
  0xea   : > { %v1793_v19 = vmul.f32 %v1742_v4, %v1527_v41  ;;  %v668_v51 = vmul.f32 %v644_v54, %v1569_v50  ;;  %v669_v27 = vmul.f32 %v1735_v36, %v1569_v50  ;;  %v671_v29 = vmul.f32 %v643_v38, %v1561_v16 }
  0xeb   : > { %v1801_v61 = vmul.f32 %v1742_v4, %v1569_v50  ;;  %v672_v12 = vmul.f32 %v644_v54, %v1561_v16  ;;  %v673_v56 = vmul.f32 %v1735_v36, %v1561_v16  ;;  %v1808_v57 = vmul.f32 %v1742_v4, %v1561_v16 }
  0xec   : > { %v675_v0 = vmul.f32 %v643_v38, %v1571_v44  ;;  %v711_v22 = vrot.slane %v647_v9, 2  ;;  %v712_v15 = vrot.slane %v651_v39, 1  ;;  %v715_v1 = vrot.slane %v659_v46, 7 }
  0xed   : > { %v676_v47 = vmul.f32 %v644_v54, %v1571_v44  ;;  %v717_v11 = vrot.slane %v663_v32, 6  ;;  %v719_v14 = vrot.slane %v667_v55, 5  ;;  %v725_v18 = vrot.slane %v648_v24, 2 }
  0xee   : > { %v713_v37 = vsel %vm425_vm1, %v712_v15, %v711_v22  ;;  %v721_v13 = vrot.slane %v671_v29, 4  ;;  %v726_v33 = vrot.slane %v652_v52, 1  ;;  %v729_v62 = vrot.slane %v660_v34, 7 }
  0xef   : > { %v714_v42 = vsel %vm428_vm3, %v655_v20, %v713_v37  ;;  %v731_v35 = vrot.slane %v664_v8, 6  ;;  %v733_v45 = vrot.slane %v668_v51, 5  ;;  %v735_v2 = vrot.slane %v672_v12, 4 }
  0xf0   : > { %v716_v38 = vsel %vm431_vm2, %v715_v1, %v714_v42  ;;  %v727_v9 = vsel %vm425_vm1, %v726_v33, %v725_v18  ;;  %v739_v39 = vrot.slane %v649_v53, 2  ;;  %v740_v46 = vrot.slane %v653_v43, 1 }
  0xf1   : > { %v718_v54 = vsel %vm434_vm4, %v717_v11, %v716_v38  ;;  %v728_v24 = vsel %vm428_vm3, %v656_v25, %v727_v9  ;;  %v743_v32 = vrot.slane %v661_v58, 7  ;;  %v745_v55 = vrot.slane %v665_v21, 6 }
  0xf2   : > { %v720_v52 = vsel %vm437_vm5, %v719_v14, %v718_v54  ;;  %v730_v34 = vsel %vm431_vm2, %v729_v62, %v728_v24  ;;  %v741_v20 = vsel %vm425_vm1, %v740_v46, %v739_v39  ;;  %v747_v8 = vrot.slane %v669_v27, 5 }
  0xf3   : > { %v677_v51 = vmul.f32 %v1735_v36, %v1571_v44  ;;  %v723_v29 = vrot.slane %v675_v0, 3  ;;  %v732_v53 = vsel %vm434_vm4, %v731_v35, %v730_v34  ;;  %v742_v43 = vsel %vm428_vm3, %v657_v26, %v741_v20 }
  0xf4   : > { %v734_v12 = vsel %vm437_vm5, %v733_v45, %v732_v53  ;;  %v737_v25 = vrot.slane %v676_v47, 3  ;;  %v744_v58 = vsel %vm431_vm2, %v743_v32, %v742_v43  ;;  %v749_v21 = vrot.slane %v673_v56, 4 }
  0xf5   : > { %v722_v22 = vsel %vm440_vm6, %v721_v13, %v720_v52  ;;  %v746_v15 = vsel %vm434_vm4, %v745_v55, %v744_v58  ;;  %v753_v27 = vrot.slane %v1761_v60, 2  ;;  %v754_v1 = vrot.slane %v1768_v10, 1 }
  0xf6   : > { %v736_v36 = vsel %vm440_vm6, %v735_v2, %v734_v12  ;;  %v748_v0 = vsel %vm437_vm5, %v747_v8, %v746_v15  ;;  %v757_v26 = vrot.slane %v1784_v59, 7  ;;  %v759_v11 = vrot.slane %v1793_v19, 6 }
  0xf7   : > { %v1837_v47 = vmul.f32 %v1742_v4, %v1571_v44  ;;  %v751_v56 = vrot.slane %v677_v51, 3  ;;  %v755_v14 = vsel %vm425_vm1, %v754_v1, %v753_v27  ;;  %v761_v18 = vrot.slane %v1801_v61, 5 }
  0xf8   : > { %v1843_v60 = vadd.f32 %v1753_v17, %v1670_v31  ;;  %v724_v10 = vsel %vm443_vm7, %v723_v29, %v722_v22  ;;  %v750_v37 = vsel %vm440_vm6, %v749_v21, %v748_v0  ;;  %v756_v59 = vsel %vm428_vm3, %v1776_v28, %v755_v14 }
  0xf9   : > { %v738_v19 = vsel %vm443_vm7, %v737_v25, %v736_v36  ;;  %v758_v4 = vsel %vm431_vm2, %v757_v26, %v756_v59  ;;  %v763_v13 = vrot.slane %v1808_v57, 4  ;;  %v776_v33 = vperm.slane %v1430_v48, 7 }
  0xfa   : > { %v760_v61 = vsel %vm434_vm4, %v759_v11, %v758_v4  ;;  %v777_v31 = vperm.slane %v1432_v49, 3  ;;  %v778_v17 = vperm.slane %v1432_v49, 7  ;;  %v783_v62 = vperm.slane %v775_v7, 3 }
  0xfb   : > { %v752_v42 = vsel %vm443_vm7, %v751_v56, %v750_v37  ;;  %v762_v28 = vsel %vm437_vm5, %v761_v18, %v760_v61  ;;  %v765_v35 = vrot.slane %v1837_v47, 3  ;;  %v784_v45 = vperm.slane %v776_v33, 3 }
  0xfc   : > { %v1862_v57 = vadd.f32 %v724_v10, %v1740_v3  ;;  %v1865_v2 = vadd.f32 %v738_v19, %v1745_v6  ;;  %v785_v38 = vperm.slane %v777_v31, 3  ;;  %v786_v9 = vperm.slane %v778_v17, 3 }
  0xfd   : > { %v1868_v49 = vsel %vm440_vm6, %v763_v13, %v762_v28  ;;  %v1871_v48 = vadd.f32 %v752_v42, %v1748_v23  ;;  %v787_v7 = vmul.f32 %v783_v62, %v1460_v5  ;;  %v788_v39 = vmul.f32 %v784_v45, %v1460_v5 }
  0xfe   : > { %v789_v46 = vmul.f32 %v785_v38, %v1460_v5  ;;  %v1877_v3 = vmul.f32 %v786_v9, %v1460_v5  ;;  %v791_v6 = vmul.f32 %v783_v62, %v1450_v63  ;;  %v792_v54 = vmul.f32 %v784_v45, %v1450_v63 }
  0xff   : > { %v793_v24 = vmul.f32 %v785_v38, %v1450_v63  ;;  %v1883_v32 = vmul.f32 %v786_v9, %v1450_v63  ;;  %v795_v23 = vmul.f32 %v783_v62, %v1508_v30  ;;  %v796_v55 = vmul.f32 %v784_v45, %v1508_v30 }
 0x100   : > { %v797_v52 = vmul.f32 %v785_v38, %v1508_v30  ;;  %v1889_v34 = vmul.f32 %v786_v9, %v1508_v30  ;;  %v799_v5 = vmul.f32 %v783_v62, %v1525_v40  ;;  %v800_v20 = vmul.f32 %v784_v45, %v1525_v40 }
 0x101   : > { %v801_v8 = vmul.f32 %v785_v38, %v1525_v40  ;;  %v1895_v51 = vmul.f32 %v786_v9, %v1525_v40  ;;  %v803_v63 = vmul.f32 %v783_v62, %v1527_v41  ;;  %v804_v29 = vmul.f32 %v784_v45, %v1527_v41 }
 0x102   : > { %v805_v53 = vmul.f32 %v785_v38, %v1527_v41  ;;  %v1901_v43 = vmul.f32 %v786_v9, %v1527_v41  ;;  %v807_v30 = vmul.f32 %v783_v62, %v1569_v50  ;;  %v808_v12 = vmul.f32 %v784_v45, %v1569_v50 }
 0x103   : > { %v809_v25 = vmul.f32 %v785_v38, %v1569_v50  ;;  %v1907_v58 = vmul.f32 %v786_v9, %v1569_v50  ;;  %v811_v40 = vmul.f32 %v783_v62, %v1561_v16  ;;  %v812_v21 = vmul.f32 %v784_v45, %v1561_v16 }
 0x104   : > { %v813_v22 = vmul.f32 %v785_v38, %v1561_v16  ;;  %v1913_v15 = vmul.f32 %v786_v9, %v1561_v16  ;;  %v815_v41 = vmul.f32 %v783_v62, %v1571_v44  ;;  %v816_v27 = vmul.f32 %v784_v45, %v1571_v44 }
 0x105   : > { %v1918_v1 = vmul.f32 %v785_v38, %v1571_v44  ;;  %v851_v36 = vrot.slane %v787_v7, 3  ;;  %v852_v0 = vrot.slane %v791_v6, 2  ;;  %v854_v50 = vrot.slane %v795_v23, 1 }
 0x106   : > { %v1921_v26 = vmul.f32 %v786_v9, %v1571_v44  ;;  %v857_v11 = vrot.slane %v803_v63, 7  ;;  %v859_v56 = vrot.slane %v807_v30, 6  ;;  %v861_v14 = vrot.slane %v811_v40, 5 }
 0x107   : > { %v853_v18 = vsel %vm425_vm1, %v852_v0, %v851_v36  ;;  %v865_v16 = vrot.slane %v788_v39, 3  ;;  %v866_v10 = vrot.slane %v792_v54, 2  ;;  %v868_v37 = vrot.slane %v796_v55, 1 }
 0x108   : > { %v855_v59 = vsel %vm428_vm3, %v854_v50, %v853_v18  ;;  %v863_v19 = vrot.slane %v815_v41, 4  ;;  %v871_v4 = vrot.slane %v804_v29, 7  ;;  %v873_v13 = vrot.slane %v808_v12, 6 }
 0x109   : > { %v856_v33 = vsel %vm431_vm2, %v799_v5, %v855_v59  ;;  %v867_v61 = vsel %vm425_vm1, %v866_v10, %v865_v16  ;;  %v875_v31 = vrot.slane %v812_v21, 5  ;;  %v879_v44 = vrot.slane %v789_v46, 3 }
 0x10a   : > { %v858_v17 = vsel %vm434_vm4, %v857_v11, %v856_v33  ;;  %v869_v62 = vsel %vm428_vm3, %v868_v37, %v867_v61  ;;  %v880_v42 = vrot.slane %v793_v24, 2  ;;  %v882_v28 = vrot.slane %v797_v52, 1 }
 0x10b   : > { %v860_v45 = vsel %vm437_vm5, %v859_v56, %v858_v17  ;;  %v870_v38 = vsel %vm431_vm2, %v800_v20, %v869_v62  ;;  %v877_v9 = vrot.slane %v816_v27, 4  ;;  %v885_v7 = vrot.slane %v805_v53, 7 }
 0x10c   : > { %v862_v39 = vsel %vm440_vm6, %v861_v14, %v860_v45  ;;  %v872_v6 = vsel %vm434_vm4, %v871_v4, %v870_v38  ;;  %v881_v54 = vsel %vm425_vm1, %v880_v42, %v879_v44  ;;  %v887_v46 = vrot.slane %v809_v25, 6 }
 0x10d   : > { %v864_v23 = vsel %vm443_vm7, %v863_v19, %v862_v39  ;;  %v874_v55 = vsel %vm437_vm5, %v873_v13, %v872_v6  ;;  %v883_v24 = vsel %vm428_vm3, %v882_v28, %v881_v54  ;;  %v889_v52 = vrot.slane %v813_v22, 5 }
 0x10e   : > { %v876_v5 = vsel %vm440_vm6, %v875_v31, %v874_v55  ;;  %v884_v20 = vsel %vm431_vm2, %v801_v8, %v883_v24  ;;  %v893_v63 = vrot.slane %v1877_v3, 3  ;;  %v894_v29 = vrot.slane %v1883_v32, 2 }
 0x10f   : > { %v878_v53 = vsel %vm443_vm7, %v877_v9, %v876_v5  ;;  %v886_v30 = vsel %vm434_vm4, %v885_v7, %v884_v20  ;;  %v891_v12 = vrot.slane %v1918_v1, 4  ;;  %v896_v25 = vrot.slane %v1889_v34, 1 }
 0x110   : > { %v888_v40 = vsel %vm437_vm5, %v887_v46, %v886_v30  ;;  %v895_v21 = vsel %vm425_vm1, %v894_v29, %v893_v63  ;;  %v899_v22 = vrot.slane %v1901_v43, 7  ;;  %v901_v8 = vrot.slane %v1907_v58, 6 }
 0x111   : > { %v890_v3 = vsel %vm440_vm6, %v889_v52, %v888_v40  ;;  %v897_v32 = vsel %vm428_vm3, %v896_v25, %v895_v21  ;;  %v903_v41 = vrot.slane %v1913_v15, 5  ;;  %v911_v27 = vadd.f32 %v864_v23, %v1862_v57 }
 0x112   : > { %v766_v34 = vsel %vm443_vm7, %v765_v35, %v1868_v49  ;;  %v898_v1 = vsel %vm431_vm2, %v1895_v51, %v897_v32  ;;  %v905_v43 = vrot.slane %v1921_v26, 4  ;;  %v912_v58 = vadd.f32 %v878_v53, %v1865_v2 }
 0x113   : > { %v774_v36 = vadd.f32 %v766_v34, %v1843_v60  ;;  %v900_v0 = vsel %vm434_vm4, %v899_v22, %v898_v1  ;;  %v892_v47 = vsel %vm443_vm7, %v891_v12, %v890_v3 }
 0x114   : > { %v902_v35 = vsel %vm437_vm5, %v901_v8, %v900_v0  ;;  %v915_v57 = vpack.c.bf16 %v912_v58, %v911_v27  ;;  %v913_v51 = vadd.f32 %v892_v47, %v1871_v48 }
 0x115   : > { %v904_v49 = vsel %vm440_vm6, %v903_v41, %v902_v35 }
 0x116   : > { %v906_v2 = vsel %vm443_vm7, %v905_v43, %v904_v49  ;;  %917 = vst [vmem:[%s220_s29] sm:$0xff] %v915_v57 }
 0x117   : > { %v914_v60 = vadd.f32 %v906_v2, %v774_v36 }
 0x119   : > { %v916_v15 = vpack.c.bf16 %v914_v60, %v913_v51 }
 0x11b   : > { %918 = vst [vmem:[%s220_s29 + $0x8] sm:$0xff] %v916_v15 }
 0x11c   : > { %1233 = shalt.err (!%p1230_p8)
}
 0x11d   : > { %1057 = dma.vmem_to_hbm [thread:$0]  (%p1354_p11), %s934_s22, 256, %s936_s6, %s920_s7  }
 0x11e PF: > { %s947_s27 = sand.u32 1, %s1264_s12   ;;  %p2013_p9 = scmp.ge.s32.totalorder %s1276_s15, 2 }
 0x11f   : > { %s948_s30 = scalar_lea.sflag [#allocation4], %s947_s27 }
 0x120   : > { %p1071_p10 = pnand %p2013_p9, %p1358_p12 }
 0x122   : > { %p1072_p1 = pneg %p1071_p10 }
 0x124   : > { %1259 = dma.done.wait (%p1072_p1), %s948_s30, 256  }
 0x125   : > { %1261 = vsyncadd (%p1072_p1), %s948_s30, 4294967040  ;;  %p17_p2 = scmp.ge.s32.totalorder %s1327_s18, 4   ;;  %s2014_s12 = smov %s1268_s13 }
 0x126   : > { %s2015_s13 = smov %s1272_s14  ;;  %s2016_s14 = smov %s1339_s21 }
 0x127   : > { %s2017_s15 = smov %s1327_s18  ;;  %19 = sbr.rel (!%p17_p2) target bundleno = 6 (0x6), region = 88 }
 0x12c   :  { %954 = vsyncpa [#allocation3], 1 }
 0x12d   :  { %956 = vsyncpa [#allocation3 + $0x1], 1 }
 0x12e   :  { %957 = vsyncpa [#allocation6], 1 }
 0x12f   :  { %958 = vsyncpa [#allocation4], 1 }
 0x130   :  { %960 = vsyncpa [#allocation4 + $0x1], 1 }

</bundles_post_ra>
